<compile_context>
chip_gen: v6e
topology: v6e:2x2x1
jax: 0.10.0
libtpu: 0.0.40
codegen_flags: <defaults>
</compile_context>

<pallas_src>
import functools

import jax
import jax.numpy as jnp
from jax.experimental import pallas as pl
from jax.experimental.pallas import tpu as pltpu


def se_kernel(x_ref, w1t_ref, w2t_ref, o_ref, *, inv_hw):
    # x_ref block: (B_TILE, C, HW) -- B_TILE batch elements per grid step.
    x = x_ref[...]                                              # (BT, C, HW)

    # Squeeze: global average pool, f32 accumulation, multiply by 1/HW.
    y = jnp.sum(x.astype(jnp.float32), axis=-1) * inv_hw        # (BT, C)

    # Excitation: fc1 (no bias) + ReLU, fc2 (no bias) + Sigmoid.
    # Weights arrive pre-transposed: w1t (C, Cr), w2t (Cr, C).
    h = jnp.dot(y, w1t_ref[...].astype(jnp.float32),
                preferred_element_type=jnp.float32)             # (BT, Cr)
    h = jnp.maximum(h, 0.0)
    s = jnp.dot(h, w2t_ref[...].astype(jnp.float32),
                preferred_element_type=jnp.float32)             # (BT, C)
    s = jax.nn.sigmoid(s)

    # Scale: broadcast per-(batch, channel) gate over the spatial (lane) axis.
    o_ref[...] = (x * s[:, :, None]).astype(o_ref.dtype)


def _choose_b_tile(B, C, HW, itemsize, budget_bytes=24 << 20):
    """Largest divisor of B whose double-buffered in+out tiles fit the budget."""
    per_b = C * HW * itemsize               # bytes of one (C, HW) slab
    # 2 buffers (pipelining) x (input tile + output tile) = 4 slabs resident.
    max_bt = max(1, budget_bytes // (4 * per_b))
    if B >= 2:
        # Keep at least 2 grid steps so the "parallel" axis can be sharded
        # across both TensorCores on v7x.
        max_bt = min(max_bt, B // 2)
    bt = 1
    for d in range(1, B + 1):
        if B % d == 0 and d <= max_bt:
            bt = d
    return bt


def se_layer(x_nchw, w1, w2):
    """x_nchw: (B, C, H, W); w1: (C//r, C); w2: (C, C//r)  (nn.Linear weights)."""
    B, C, H, W = x_nchw.shape
    HW = H * W
    Cr = w1.shape[0]

    x = x_nchw.reshape(B, C, HW)            # free reshape, HW on the lane axis
    w1_t = w1.T                             # (C, Cr) -- tiny, one-time
    w2_t = w2.T                             # (Cr, C)

    bt = _choose_b_tile(B, C, HW, x.dtype.itemsize)
    kernel = functools.partial(se_kernel, inv_hw=1.0 / HW)

    out = pl.pallas_call(
        kernel,
        out_shape=jax.ShapeDtypeStruct((B, C, HW), x.dtype),
        grid_spec=pltpu.PrefetchScalarGridSpec(
            num_scalar_prefetch=0,
            grid=(B // bt,),
            in_specs=[
                pl.BlockSpec((bt, C, HW), lambda b: (b, 0, 0)),
                # Constant block index -> weights stay resident (no per-step DMA).
                pl.BlockSpec((C, Cr), lambda b: (0, 0)),
                pl.BlockSpec((Cr, C), lambda b: (0, 0)),
            ],
            out_specs=pl.BlockSpec((bt, C, HW), lambda b: (b, 0, 0)),
        ),
        compiler_params=pltpu.CompilerParams(
            dimension_semantics=("parallel",),
            vmem_limit_bytes=48 << 20,      # within v7x's 64 MiB physical VMEM
        ),
    )(x, w1_t, w2_t)
    return out.reshape(B, C, H, W)
    # TODO(synk): for stem-sized maps (huge HW) or B=1, split into a pool+FC
    # kernel plus a separately tiled elementwise-scale kernel so the whole
    # (C, HW) slab need not be resident per step.


def se_layer_ref(x_nchw, w1, w2):
    """Pure-JAX reference mirroring the PyTorch forward."""
    y = jnp.mean(x_nchw, axis=(2, 3))                # (B, C)
    h = jnp.maximum(y @ w1.T, 0.0)                   # (B, Cr)
    s = jax.nn.sigmoid(h @ w2.T)                     # (B, C)
    return x_nchw * s[:, :, None, None]


if __name__ == "__main__":
    # Small shapes consistent with the module: channel=64, reduction=16 -> hidden=4
    B, C, H, W = 2, 64, 16, 16
    reduction = 16
    Cr = C // reduction

    key = jax.random.PRNGKey(0)
    kx, k1, k2 = jax.random.split(key, 3)
    x = jax.random.normal(kx, (B, C, H, W), dtype=jnp.float32)
    # nn.Linear weight shapes: fc1 (C//r, C), fc2 (C, C//r), no bias
    w1 = jax.random.normal(k1, (Cr, C), dtype=jnp.float32) * 0.1
    w2 = jax.random.normal(k2, (C, Cr), dtype=jnp.float32) * 0.1

    out = se_layer(x, w1, w2)
    out = jax.block_until_ready(out)

    ref = se_layer_ref(x, w1, w2)
    assert out.shape == (B, C, H, W)
    assert jnp.allclose(out, ref, atol=1e-5, rtol=1e-5), "mismatch vs reference"

    print("KERNEL_OK")
</pallas_src>

<mosaic_0001>
module attributes {stable_mosaic.version = 11 : i64} {
  func.func @se_kernel(%arg0: i32, %arg1: memref<1x64x256xf32, #tpu.memory_space<vmem>>, %arg2: memref<64x4xf32, #tpu.memory_space<vmem>>, %arg3: memref<4x64xf32, #tpu.memory_space<vmem>>, %arg4: memref<1x64x256xf32, #tpu.memory_space<vmem>>) attributes {dimension_semantics = [#tpu.dimension_semantics<parallel>], iteration_bounds = array<i64: 2>, scalar_prefetch = 0 : i64, scratch_operands = 0 : i64, tpu.core_type = #tpu.core_type<tc>, window_params = [{transform_indices = @transform_0, window_bounds = array<i64: 1, 64, 256>}, {pipeline_mode = #tpu.pipeline_mode<synchronous>, transform_indices = @transform_1, window_bounds = array<i64: 64, 4>}, {pipeline_mode = #tpu.pipeline_mode<synchronous>, transform_indices = @transform_2, window_bounds = array<i64: 4, 64>}, {transform_indices = @transform_3, window_bounds = array<i64: 1, 64, 256>}]} {
    %c0 = arith.constant 0 : index
    %c0_0 = arith.constant 0 : index
    %c0_1 = arith.constant 0 : index
    %0 = vector.load %arg1[%c0, %c0_0, %c0_1] : memref<1x64x256xf32, #tpu.memory_space<vmem>>, vector<1x64x256xf32>
    %cst = arith.constant dense<0.000000e+00> : vector<1x64xf32>
    %1 = vector.multi_reduction <add>, %0, %cst [2] : vector<1x64x256xf32> to vector<1x64xf32>
    %cst_2 = arith.constant 3.906250e-03 : f32
    %2 = vector.broadcast %cst_2 : f32 to vector<1x64xf32>
    %3 = arith.mulf %1, %2 : vector<1x64xf32>
    %c0_3 = arith.constant 0 : index
    %c0_4 = arith.constant 0 : index
    %4 = vector.load %arg2[%c0_3, %c0_4] : memref<64x4xf32, #tpu.memory_space<vmem>>, vector<64x4xf32>
    %cst_5 = arith.constant dense<0.000000e+00> : vector<1x4xf32>
    %5 = tpu.matmul %3, %4, %cst_5 {dimension_numbers = #tpu.dot_dimension_numbers<[1], [0], [0], [1], [0, 0, 1, 1], [], []>} : vector<1x64xf32>, vector<64x4xf32>, vector<1x4xf32> -> vector<1x4xf32>
    %cst_6 = arith.constant 0.000000e+00 : f32
    %6 = vector.broadcast %cst_6 : f32 to vector<1x4xf32>
    %7 = arith.maximumf %5, %6 : vector<1x4xf32>
    %c0_7 = arith.constant 0 : index
    %c0_8 = arith.constant 0 : index
    %8 = vector.load %arg3[%c0_7, %c0_8] : memref<4x64xf32, #tpu.memory_space<vmem>>, vector<4x64xf32>
    %cst_9 = arith.constant dense<0.000000e+00> : vector<1x64xf32>
    %9 = tpu.matmul %7, %8, %cst_9 {dimension_numbers = #tpu.dot_dimension_numbers<[1], [0], [0], [1], [0, 0, 1, 1], [], []>} : vector<1x4xf32>, vector<4x64xf32>, vector<1x64xf32> -> vector<1x64xf32>
    %10 = arith.negf %9 : vector<1x64xf32>
    %11 = math.exp %10 : vector<1x64xf32>
    %cst_10 = arith.constant 1.000000e+00 : f32
    %12 = vector.broadcast %cst_10 : f32 to vector<1x64xf32>
    %13 = arith.addf %12, %11 : vector<1x64xf32>
    %14 = arith.divf %12, %13 : vector<1x64xf32>
    %15 = vector.shape_cast %14 : vector<1x64xf32> to vector<1x64x1xf32>
    %16 = vector.broadcast %15 : vector<1x64x1xf32> to vector<1x64x256xf32>
    %17 = arith.mulf %0, %16 : vector<1x64x256xf32>
    %c0_11 = arith.constant 0 : index
    %c0_12 = arith.constant 0 : index
    %c0_13 = arith.constant 0 : index
    %18 = vector.load %arg4[%c0_11, %c0_12, %c0_13] : memref<1x64x256xf32, #tpu.memory_space<vmem>>, vector<1x64x256xf32>
    tpu.vector_store %arg4[%c0_11, %c0_12, %c0_13], %17 {strides = array<i32>} : memref<1x64x256xf32, #tpu.memory_space<vmem>>, vector<1x64x256xf32>,
    return
  }
  func.func @transform_0(%arg0: i32) -> (i32, i32, i32) {
    %c0_i32 = arith.constant 0 : i32
    %c0_i32_0 = arith.constant 0 : i32
    %c0_i32_1 = arith.constant 0 : i32
    return %arg0, %c0_i32, %c0_i32_0 : i32, i32, i32
  }
  func.func @transform_1(%arg0: i32) -> (i32, i32) {
    %c0_i32 = arith.constant 0 : i32
    %c0_i32_0 = arith.constant 0 : i32
    %c0_i32_1 = arith.constant 0 : i32
    return %c0_i32, %c0_i32_0 : i32, i32
  }
  func.func @transform_2(%arg0: i32) -> (i32, i32) {
    %c0_i32 = arith.constant 0 : i32
    %c0_i32_0 = arith.constant 0 : i32
    %c0_i32_1 = arith.constant 0 : i32
    return %c0_i32, %c0_i32_0 : i32, i32
  }
  func.func @transform_3(%arg0: i32) -> (i32, i32, i32) {
    %c0_i32 = arith.constant 0 : i32
    %c0_i32_0 = arith.constant 0 : i32
    %c0_i32_1 = arith.constant 0 : i32
    return %arg0, %c0_i32, %c0_i32_0 : i32, i32, i32
  }
}

</mosaic_0001>

<bundles_post_ra>
// kernel: tpu_custom_call.1
= control target key start
LH: loop header
LB: loop body
LE: loop exit
PB: predicated region body
PF: predicated region fallthrough
CT: control target
= control target key end

     0   :  { %8 = vsyncpa [#allocation3], 0  ;;  %s1134_s0 = inlined_call_operand.hbm [shape: f32[2,64,256], index: 0, kind: input, shape index: {}]   ;;  %s1135_s1 = inlined_call_operand.vmem [shape: f32[64,4], index: 1, kind: input, shape index: {}]   ;;  %s1136_s2 = inlined_call_operand.vmem [shape: f32[4,64], index: 2, kind: input, shape index: {}]   ;;  %s1137_s3 = inlined_call_operand.hbm [shape: f32[2,64,256], index: 3, kind: output, shape index: {}]  }
   0x1   :  { %10 = vsyncpa [#allocation3 + $0x1], 0 }
   0x2   :  { %11 = vsyncpa [#allocation4], 0 }
   0x3   :  { %13 = vsyncpa [#allocation4 + $0x1], 0  ;;  %s854_s12 = smov 0   ;;  %s856_s13 = smov 0  }
   0x4   :  { %s858_s14 = smov 0   ;;  %s860_s15 = smov 0  }
   0x5 LB: > { %s875_s16 = sadd.s32 4294967295, %s824_s15   ;;  %s621_s17 = sadd.s32 4294967294, %s824_s15   ;;  %s824_s15 = sphi %s860_s15, %s1152_s15   ;;  %s820_s14 = sphi %s858_s14, %s1151_s14   ;;  %s816_s13 = sphi %s856_s13, %s1150_s13   ;;  %s812_s12 = sphi %s854_s12, %s1149_s12  }
   0x6   : > { %s879_s18 = sadd.s32 1, %s824_s15   ;;  %s26_s19 = sadd.s32 1, %s820_s14 }
   0x7   : > { %s23_s20 = ssub.s32 %s824_s15, %s879_s18  ;;  %p33_p0 = scmp.ne.s32.totalorder %s820_s14, %s816_s13 }
   0x8   : > { %p24_p1 = scmp.eq.s32.totalorder %s23_s20, 0  ;;  %p34_p2 = scmp.eq.s32.totalorder %s824_s15, 0 }
   0x9   : > { %p39_p3 = scmp.ne.s32.totalorder %s816_s13, %s812_s12  ;;  %p40_p4 = scmp.eq.s32.totalorder %s875_s16, 0 }
   0xa   : > { %s891_s21 = scalar_select %p24_p1, %s820_s14, %s26_s19  }
   0xb   : > { %p893_p5 = por %p34_p2, %p33_p0  ;;  %p897_p6 = por %p40_p4, %p39_p3 }
   0xc   : > { %p105_p7 = scmp.eq.s32.totalorder %s875_s16, 1  ;;  %p111_p8 = scmp.eq.s32.totalorder %s621_s17, 1 }
   0xd   : > { %s1141_s23 = scalar_select %p897_p6, 1, 0 }
   0xe   : > { %p688_p10 = scmp.lt.s32.totalorder %s824_s15, 2  ;;  %p904_p11 = por %p105_p7, %p33_p0 }
   0xf   : > { %p908_p12 = por %p111_p8, %p39_p3  ;;  %s137_s26 = sand.u32 1, %s820_s14  }
  0x10   : > { %s1142_s24 = scalar_select %p904_p11, 1, 0 }
  0x11   : > { %s1143_s25 = scalar_select %p908_p12, 1, 0 }
  0x12   : > { %s639_s27 = sshll.u32 %s824_s15, 11  ;;  %s624_s28 = sshll.u32 %s137_s26, 7 }
  0x13   : > { %s917_s4 = scalar_lea.hbm %s1134_s0, %s639_s27  ;;  %s141_s5 = scalar_lea.vmem [#allocation2], %s624_s28 }
  0x14   : > { %s148_s6 = sshll.u32 %s141_s5, 4  ;;  %p921_p13 = pnand %p688_p10, %p893_p5  ;;  %s925_s6 = int_to_ptr.vmem [resolvable:$true] %s148_s6 }
  0x15   : > { %s927_s8 = scalar_lea.sflag [#allocation3], %s137_s26  ;;  %s732_s9 = scalar_lea.hbm %s917_s4, 2048 }
  0x16   : > { %p733_p0 = scmp.ne.s32.totalorder %s917_s4, %s732_s9  ;;  %p734_p1 = pneg %p921_p13 }
  0x17   : > { %s737_s17 = scalar_lea.hbm %s1134_s0, 4096  ;;  %p738_p4 = scmp.lt.s32.totalorder %s917_s4, %s1134_s0 }
  0x18   : > { %p735_p2 = pnand %p734_p1, %p733_p0  ;;  %p739_p5 = scmp.lt.s32.totalorder %s737_s17, %s732_s9 }
  0x1a   : > { %p736_p3 = pneg %p735_p2  ;;  %p740_p7 = por %p739_p5, %p738_p4 }
  0x1c   : > { %p741_p8 = pnand %p740_p7, %p736_p3 }
  0x1e   : > { %744 = shalt.err (!%p741_p8)
}
  0x1f   : > { %s745_s22 = scalar_lea.vmem %s925_s6, 2048  ;;  %s826_s26 = smov [#allocation2]  }
  0x20   : > { %p746_p10 = scmp.ne.s32.totalorder %s925_s6, %s745_s22  ;;  %s750_s27 = sshll.u32 %s826_s26, 4  ;;  %s751_s27 = int_to_ptr.vmem [resolvable:$false] %s750_s27 }
  0x21   : > { %s752_s28 = scalar_lea.vmem %s751_s27, 4096  ;;  %p753_p2 = scmp.lt.s32.totalorder %s925_s6, %s751_s27 }
  0x22   : > { %p748_p9 = pnand %p746_p10, %p734_p1  ;;  %p754_p12 = scmp.lt.s32.totalorder %s752_s28, %s745_s22 }
  0x24   : > { %p749_p0 = pneg %p748_p9  ;;  %p755_p11 = por %p754_p12, %p753_p2 }
  0x26   : > { %p756_p6 = pnand %p755_p11, %p749_p0 }
  0x28   : > { %759 = shalt.err (!%p756_p6)
}
  0x29   : > { %s827_s29 = smov 256   ;;  %s828_s30 = smov 16  }
  0x2a   : > { %683 = dma.hbm_to_vmem [thread:$0]  (!%p921_p13), %s917_s4, 2048, %s925_s6, %s927_s8, %s827_s29, %s827_s29, %s828_s30  }
  0x2b   : > { %p627_p9 = scmp.ge.s32.totalorder %s824_s15, 1  ;;  %p156_p1 = scmp.lt.s32.totalorder %s824_s15, 3 }
  0x2d   : > { %p157_p3 = pnand %p627_p9, %p156_p1 }
  0x2e   : > { %s951_s5 = sand.u32 (!%p157_p3), 1, %s816_s13   ;;  %p1145_p6 = scmp.ne.s32.totalorder (!%p157_p3), %s1141_s23, 0 }
  0x2f   : > { %160 = sbr.rel (%p157_p3) target bundleno = 781 (0x30d), region = 32  ;;  %s628_s9 = sshll.u32 (!%p157_p3), %s951_s5, 7 }
  0x30   : > { %s163_s10 = scalar_lea.sflag (!%p157_p3), [#allocation3], %s951_s5  ;;  %s166_s11 = scalar_lea.vmem (!%p157_p3), [#allocation2], %s628_s9 }
  0x34   : > { %803 = dma.done.wait (%p1145_p6), %s163_s10, 2048  }
  0x35   : > { %805 = vsyncadd (%p1145_p6), %s163_s10, 4294965248  ;;  %v961_v0 = vld [vmem:[%s166_s11] sm:$0xff]  ;;  %v963_v1 = vld [vmem:[%s166_s11 + $0x8] sm:$0xff]  ;;  %v829_v24 = vmov 0.0   ;;  %vm830_vm0 = vmmov 0   ;;  %v253_v33 = vlaneseq  ;;  %vm264_vm1 = vcmask 130112  }
  0x36   : > { %v965_v2 = vld [vmem:[%s166_s11 + $0x20] sm:$0xff]  ;;  %v205_v3 = vadd.f32 %v963_v1, %v961_v0  ;;  %v969_v4 = vld [vmem:[%s166_s11 + $0x28] sm:$0xff]  ;;  %v971_v5 = vld [vmem:[%s166_s11 + $0x10] sm:$0xff]  ;;  %652 = vmatprep.subr.mxu0 %v829_v24  ;;  %671 = vmatprep.subr.mxu1 %v829_v24  ;;  %vm271_vm2 = vcmask 195712   ;;  %vm278_vm3 = vcmask 261312   ;;  %vm285_vm4 = vcmask 326912  }
  0x37   : > { %v973_v6 = vld [vmem:[%s166_s11 + $0x18] sm:$0xff]  ;;  %v211_v7 = vadd.f32 %v969_v4, %v965_v2  ;;  %v977_v8 = vld [vmem:[%s166_s11 + $0x30] sm:$0xff]  ;;  %v985_v12 = vld [vmem:[%s166_s11 + $0x40] sm:$0xff]  ;;  %668 = vmatprep.mubr.msk.f32.mxu0 %vm830_vm0, %v829_v24  ;;  %673 = vmatprep.mubr.msk.f32.mxu1 %vm830_vm0, %v829_v24  ;;  %v254_v34 = vand.u32 127, %v253_v33  ;;  %v1033_v35 = vshrl.u32 %v253_v33, 7  ;;  %vm292_vm5 = vcmask 392512  }
  0x38   : > { %v979_v9 = vld [vmem:[%s166_s11 + $0x38] sm:$0xff]  ;;  %206 = vadd.xlane.f32.xlu0 %v205_v3  ;;  %v208_v10 = vadd.f32 %v973_v6, %v971_v5  ;;  %v987_v13 = vld [vmem:[%s166_s11 + $0x48] sm:$0xff]  ;;  %v989_v14 = vld [vmem:[%s166_s11 + $0x50] sm:$0xff]  ;;  %vm299_vm6 = vcmask 458112   ;;  %vm306_vm7 = vcmask 523712   ;;  %vm308_vm8 = vcmask 523264  }
  0x39   : > { %212 = vadd.xlane.f32.xlu1 %v211_v7  ;;  %v214_v11 = vadd.f32 %v979_v9, %v977_v8  ;;  %v991_v15 = vld [vmem:[%s166_s11 + $0x58] sm:$0xff]  ;;  %v217_v16 = vadd.f32 %v987_v13, %v985_v12  ;;  %v997_v18 = vld [vmem:[%s166_s11 + $0x60] sm:$0xff]  ;;  %v999_v19 = vld [vmem:[%s166_s11 + $0x68] sm:$0xff]  ;;  %v259_v36 = vadd.s32 4294967288, %v254_v34  ;;  %v266_v38 = vadd.s32 4294967280, %v254_v34  ;;  %s1054_s6 = scalar_lea.vmem [#allocation5], %s628_s9 }
  0x3a   : > { %v220_v17 = vadd.f32 %v991_v15, %v989_v14  ;;  %v1001_v20 = vld [vmem:[%s166_s11 + $0x70] sm:$0xff]  ;;  %v1003_v21 = vld [vmem:[%s166_s11 + $0x78] sm:$0xff]  ;;  %v223_v22 = vadd.f32 %v999_v19, %v997_v18  ;;  %v242_v27 = vld [vmem:[%s1135_s1 + $0x28] sm:$0xff]  ;;  %v273_v39 = vadd.s32 4294967272, %v254_v34  ;;  %v257_v41 = vsub.s32 %v254_v34, %v1033_v35  ;;  %s640_s9 = sshll.u32 %s875_s16, 11  ;;  %s548_s7 = sshll.u32 %s1054_s6, 4  ;;  %s1087_s7 = int_to_ptr.vmem [resolvable:$true] %s548_s7 }
  0x3b   : > { %v226_v23 = vadd.f32 %v1003_v21, %v1001_v20  ;;  %v244_v25 = vld [vmem:[%s1135_s1 + $0x38] sm:$0xff]  ;;  %v243_v26 = vld [vmem:[%s1135_s1 + $0x30] sm:$0xff]  ;;  %v241_v28 = vld [vmem:[%s1135_s1 + $0x20] sm:$0xff]  ;;  %v262_v43 = vsub.s32 %v259_v36, %v1033_v35  ;;  %v280_v44 = vadd.s32 4294967264, %v254_v34  ;;  %v269_v45 = vsub.s32 %v266_v38, %v1033_v35  ;;  %s1085_s19 = scalar_lea.hbm %s1137_s3, %s640_s9  ;;  %s535_s16 = scalar_lea.sflag [#allocation4], %s951_s5 }
  0x3c   : > { %209 = vadd.xlane.f32.xlu0 %v208_v10  ;;  %653 = vmatpush3.msra.mxu0 %v244_v25  ;;  %v240_v29 = vld [vmem:[%s1135_s1 + $0x18] sm:$0xff]  ;;  %v239_v30 = vld [vmem:[%s1135_s1 + $0x10] sm:$0xff]  ;;  %v238_v31 = vld [vmem:[%s1135_s1 + $0x8] sm:$0xff]  ;;  %v276_v48 = vsub.s32 %v273_v39, %v1033_v35  ;;  %v287_v49 = vadd.s32 4294967256, %v254_v34  ;;  %v294_v56 = vadd.s32 4294967248, %v254_v34  ;;  %v301_v61 = vadd.s32 4294967240, %v254_v34 }
  0x3d   : > { %215 = vadd.xlane.f32.xlu1 %v214_v11  ;;  %654 = vmatprep.subr.mxu0 %v829_v24  ;;  %v237_v32 = vld [vmem:[%s1135_s1] sm:$0xff]  ;;  %v283_v55 = vsub.s32 %v280_v44, %v1033_v35  ;;  %vm387_vm9 = vcmask 1043456   ;;  %vm383_vm10 = vcmask 31744   ;;  %v469_v44 = vsub.s32 0, %v1033_v35  ;;  %s760_s20 = scalar_lea.vmem %s1087_s7, 2048  ;;  %p1146_p12 = scmp.ne.s32.totalorder %s1142_s24, 0 }
  0x3e   : > { %655 = vmatpush3.msra.mxu0 %v243_v26  ;;  %v290_v60 = vsub.s32 %v287_v49, %v1033_v35  ;;  %v382_v34 = vld [vmem:[%s1136_s2] sm:$0xf]  ;;  %p761_p11 = scmp.ne.s32.totalorder %s1087_s7, %s760_s20  ;;  %s831_s22 = smov [#allocation5]  }
  0x3f   : > { %656 = vmatprep.subr.mxu0 %v829_v24  ;;  %672 = vmatpush3.msk.msra.mxu1 %vm387_vm9, %v382_v34  ;;  %s764_s26 = sshll.u32 %s831_s22, 4  ;;  %s765_s26 = int_to_ptr.vmem [resolvable:$false] %s764_s26 }
  0x40   : > { %218 = vadd.xlane.f32.xlu0 %v217_v16  ;;  %657 = vmatpush3.msra.mxu0 %v242_v27  ;;  %p762_p13 = pnand %p761_p11, %p1146_p12  ;;  %s766_s27 = scalar_lea.vmem %s765_s26, 4096 }
  0x41   : > { %221 = vadd.xlane.f32.xlu1 %v220_v17  ;;  %658 = vmatprep.subr.mxu0 %v829_v24  ;;  %v297_v17 = vsub.s32 %v294_v56, %v1033_v35  ;;  %p767_p5 = scmp.lt.s32.totalorder %s1087_s7, %s765_s26  ;;  %p768_p7 = scmp.lt.s32.totalorder %s766_s27, %s760_s20 }
  0x42   : > { %659 = vmatpush3.msra.mxu0 %v241_v28  ;;  %p763_p4 = pneg %p762_p13 }
  0x43   : > { %660 = vmatprep.subr.mxu0 %v829_v24  ;;  %p769_p8 = por %p768_p7, %p767_p5 }
  0x44   : > { %224 = vadd.xlane.f32.xlu0 %v223_v22  ;;  %661 = vmatpush3.msra.mxu0 %v240_v29 }
  0x45   : > { %227 = vadd.xlane.f32.xlu1 %v226_v23  ;;  %662 = vmatprep.subr.mxu0 %v829_v24  ;;  %p770_p10 = pnand %p769_p8, %p763_p4 }
  0x46   : > { %663 = vmatpush3.msra.mxu0 %v239_v30 }
  0x47   : > { %664 = vmatprep.subr.mxu0 %v829_v24 }
  0x48   : > { %665 = vmatpush3.msra.mxu0 %v238_v31 }
  0x49   : > { %666 = vmatprep.subr.mxu0 %v829_v24  ;;  %v304_v24 = vsub.s32 %v301_v61, %v1033_v35 }
  0x4a   : > { %667 = vmatpush3.msra.mxu0 %v237_v32 }
  0xc1   : > { %v207_v37 = vpop.xlane.xlu0 %206 }
  0xc2   : > { %v213_v40 = vpop.xlane.xlu1 %212  ;;  %v229_v42 = vmul.f32 0.00390625, %v207_v37 }
  0xc3   : > { %v231_v46 = vmul.f32 0.00390625, %v213_v40 }
  0xc4   : > { %v258_v53 = vrot.slane %v229_v42, %v257_v41 }
  0xc5   : > { %v210_v47 = vpop.xlane.xlu0 %209  ;;  %v270_v57 = vrot.slane %v231_v46, %v269_v45 }
  0xc6   : > { %v230_v50 = vmul.f32 0.00390625, %v210_v47  ;;  %v216_v51 = vpop.xlane.xlu1 %215 }
  0xc7   : > { %v232_v52 = vmul.f32 0.00390625, %v216_v51 }
  0xc8   : > { %v263_v54 = vrot.slane %v230_v50, %v262_v43 }
  0xc9   : > { %v277_v58 = vrot.slane %v232_v52, %v276_v48  ;;  %v219_v59 = vpop.xlane.xlu0 %218 }
  0xca   : > { %v265_v62 = vsel %vm264_vm1, %v263_v54, %v258_v53  ;;  %v233_v63 = vmul.f32 0.00390625, %v219_v59  ;;  %v222_v3 = vpop.xlane.xlu1 %221 }
  0xcb   : > { %v272_v7 = vsel %vm271_vm2, %v270_v57, %v265_v62  ;;  %v234_v10 = vmul.f32 0.00390625, %v222_v3 }
  0xcc   : > { %v279_v11 = vsel %vm278_vm3, %v277_v58, %v272_v7  ;;  %v284_v16 = vrot.slane %v233_v63, %v283_v55 }
  0xcd   : > { %v291_v22 = vrot.slane %v234_v10, %v290_v60  ;;  %v225_v23 = vpop.xlane.xlu0 %224 }
  0xce   : > { %v286_v25 = vsel %vm285_vm4, %v284_v16, %v279_v11  ;;  %v235_v26 = vmul.f32 0.00390625, %v225_v23  ;;  %v228_v27 = vpop.xlane.xlu1 %227 }
  0xcf   : > { %v236_v28 = vmul.f32 0.00390625, %v228_v27  ;;  %v293_v30 = vsel %vm292_vm5, %v291_v22, %v286_v25 }
  0xd0   : > { %v298_v29 = vrot.slane %v235_v26, %v297_v17 }
  0xd1   : > { %v305_v31 = vrot.slane %v236_v28, %v304_v24 }
  0xd2   : > { %v300_v32 = vsel %vm299_vm6, %v298_v29, %v293_v30 }
  0xd3   : > { %v307_v33 = vsel %vm306_vm7, %v305_v31, %v300_v32 }
  0xd4   : > { %669 = vmatmul.mubr.msk.f32.vlgmr.msra.gmra.mxu0 %vm308_vm8, %v307_v33 }
 0x194   : > { %v377_v36 = vpop.f32.mrf.mxu0 }
 0x195   : > { %v381_v37 = vmax.f32 %v377_v36, 0.0 }
 0x196   : > { %v670_v38 = vpop.f32.mrf.mxu0 }
 0x197   : > { %674 = vmatmul.mubr.msk.f32.vlgmr.msra.gmra.mxu1 %vm383_vm10, %v381_v37 }
 0x257   : > { %v457_v39 = vpop.f32.mrf.mxu1 }
 0x258   : > { %v633_v40 = vmul.f32 -1.442695, %v457_v39 }
 0x259   : > { %v675_v41 = vpop.f32.mrf.mxu1 }
 0x25a   : > { %728 = vpow2.f32 %v633_v40 }
 0x267   : > { %v729_v42 = vpop.eup %728 }
 0x268   : > { %v464_v43 = vadd.f32 1.0, %v729_v42 }
 0x26a   : > { %730 = vrcp.f32 %v464_v43 }
 0x277   : > { %v731_v45 = vpop.eup %730 }
 0x278   : > { %v470_v46 = vrot.slane %v731_v45, %v469_v44 }
 0x27a   : > { %476 = vbcast.lane.b32.xlu1 %v470_v46, 264  ;;  %472 = vbcast.lane.b32.xlu0 %v470_v46, 256 }
 0x27e   : > { %480 = vbcast.lane.b32.xlu1 %v470_v46, 272  ;;  %488 = vbcast.lane.b32.xlu0 %v470_v46, 288 }
 0x282   : > { %484 = vbcast.lane.b32.xlu1 %v470_v46, 280  ;;  %496 = vbcast.lane.b32.xlu0 %v470_v46, 304 }
 0x286   : > { %492 = vbcast.lane.b32.xlu1 %v470_v46, 296 }
 0x28a   : > { %500 = vbcast.lane.b32.xlu1 %v470_v46, 312 }
 0x2ec   : > { %v477_v47 = vpop.permute.xlu1 %476  ;;  %v473_v48 = vpop.permute.xlu0 %472 }
 0x2ed   : > { %v504_v49 = vmul.f32 %v477_v47, %v971_v5  ;;  %v505_v50 = vmul.f32 %v477_v47, %v973_v6  ;;  %v502_v51 = vmul.f32 %v473_v48, %v961_v0  ;;  %v503_v35 = vmul.f32 %v473_v48, %v963_v1 }
 0x2ef   : > { %520 = vst [vmem:[%s1054_s6 + $0x10] sm:$0xff] %v504_v49  ;;  %521 = vst [vmem:[%s1054_s6 + $0x18] sm:$0xff] %v505_v50 }
 0x2f0   : > { %518 = vst [vmem:[%s1054_s6] sm:$0xff] %v502_v51  ;;  %519 = vst [vmem:[%s1054_s6 + $0x8] sm:$0xff] %v503_v35  ;;  %v481_v5 = vpop.permute.xlu1 %480  ;;  %v489_v0 = vpop.permute.xlu0 %488 }
 0x2f1   : > { %v506_v1 = vmul.f32 %v481_v5, %v965_v2  ;;  %v507_v6 = vmul.f32 %v481_v5, %v969_v4  ;;  %v510_v52 = vmul.f32 %v489_v0, %v985_v12  ;;  %v511_v53 = vmul.f32 %v489_v0, %v987_v13 }
 0x2f3   : > { %522 = vst [vmem:[%s1054_s6 + $0x20] sm:$0xff] %v506_v1  ;;  %523 = vst [vmem:[%s1054_s6 + $0x28] sm:$0xff] %v507_v6 }
 0x2f4   : > { %526 = vst [vmem:[%s1054_s6 + $0x40] sm:$0xff] %v510_v52  ;;  %527 = vst [vmem:[%s1054_s6 + $0x48] sm:$0xff] %v511_v53  ;;  %v485_v54 = vpop.permute.xlu1 %484  ;;  %v497_v55 = vpop.permute.xlu0 %496 }
 0x2f5   : > { %v508_v2 = vmul.f32 %v485_v54, %v977_v8  ;;  %v509_v56 = vmul.f32 %v485_v54, %v979_v9  ;;  %v514_v4 = vmul.f32 %v497_v55, %v997_v18  ;;  %v515_v12 = vmul.f32 %v497_v55, %v999_v19 }
 0x2f7   : > { %524 = vst [vmem:[%s1054_s6 + $0x30] sm:$0xff] %v508_v2  ;;  %525 = vst [vmem:[%s1054_s6 + $0x38] sm:$0xff] %v509_v56 }
 0x2f8   : > { %530 = vst [vmem:[%s1054_s6 + $0x60] sm:$0xff] %v514_v4  ;;  %531 = vst [vmem:[%s1054_s6 + $0x68] sm:$0xff] %v515_v12  ;;  %v493_v13 = vpop.permute.xlu1 %492 }
 0x2f9   : > { %v512_v57 = vmul.f32 %v493_v13, %v989_v14  ;;  %v513_v58 = vmul.f32 %v493_v13, %v991_v15 }
 0x2fb   : > { %528 = vst [vmem:[%s1054_s6 + $0x50] sm:$0xff] %v512_v57  ;;  %529 = vst [vmem:[%s1054_s6 + $0x58] sm:$0xff] %v513_v58 }
 0x2fc   : > { %v501_v8 = vpop.permute.xlu1 %500 }
 0x2fd   : > { %v516_v9 = vmul.f32 %v501_v8, %v1001_v20  ;;  %v517_v14 = vmul.f32 %v501_v8, %v1003_v21 }
 0x2ff   : > { %532 = vst [vmem:[%s1054_s6 + $0x70] sm:$0xff] %v516_v9  ;;  %533 = vst [vmem:[%s1054_s6 + $0x78] sm:$0xff] %v517_v14 }
 0x300   : > { %773 = shalt.err (!%p770_p10)
}
 0x301   : > { %s774_s28 = scalar_lea.hbm %s1085_s19, 2048  ;;  %s778_s10 = scalar_lea.hbm %s1137_s3, 4096 }
 0x302   : > { %p775_p0 = scmp.ne.s32.totalorder %s1085_s19, %s774_s28  ;;  %p779_p1 = scmp.lt.s32.totalorder %s1085_s19, %s1137_s3 }
 0x303   : > { %p780_p3 = scmp.lt.s32.totalorder %s778_s10, %s774_s28 }
 0x304   : > { %p776_p2 = pnand %p775_p0, %p1146_p12 }
 0x305   : > { %p781_p6 = por %p780_p3, %p779_p1 }
 0x306   : > { %p777_p9 = pneg %p776_p2 }
 0x308   : > { %p782_p11 = pnand %p781_p6, %p777_p9 }
 0x30a   : > { %785 = shalt.err (!%p782_p11)
}
 0x30b   : > { %s832_s4 = smov 256   ;;  %s833_s6 = smov 16  }
 0x30c   : > { %678 = dma.vmem_to_hbm [thread:$0]  (%p1146_p12), %s1087_s7, 2048, %s1085_s19, %s535_s16, %s832_s4, %s832_s4, %s833_s6  }
 0x30d PF: > { %s563_s9 = sand.u32 1, %s812_s12   ;;  %p1147_p13 = scmp.ne.s32.totalorder %s1143_s25, 0 }
 0x30e   : > { %p1148_p4 = scmp.ge.s32.totalorder %s824_s15, 2  ;;  %s564_s8 = scalar_lea.sflag [#allocation4], %s563_s9 }
 0x310   : > { %p685_p5 = pnand %p1148_p4, %p1147_p13 }
 0x312   : > { %p686_p7 = pneg %p685_p5 }
 0x314   : > { %807 = dma.done.wait (%p686_p7), %s564_s8, 2048  }
 0x315   : > { %809 = vsyncadd (%p686_p7), %s564_s8, 4294965248  ;;  %p16_p8 = scmp.ge.s32.totalorder %s879_s18, 4   ;;  %s1149_s12 = smov %s816_s13 }
 0x316   : > { %s1150_s13 = smov %s820_s14  ;;  %s1151_s14 = smov %s891_s21 }
 0x317   : > { %s1152_s15 = smov %s879_s18  ;;  %18 = sbr.rel (!%p16_p8) target bundleno = 5 (0x5), region = 77 }
 0x31c   :  { %569 = vsyncpa [#allocation3], 1 }
 0x31d   :  { %571 = vsyncpa [#allocation3 + $0x1], 1 }
 0x31e   :  { %572 = vsyncpa [#allocation4], 1 }
 0x31f   :  { %574 = vsyncpa [#allocation4 + $0x1], 1 }

</bundles_post_ra>
